<compile_context>
chip_gen: v5e
topology: v5e:2x2
jax: 0.10.0
libtpu: 0.0.40
codegen_flags: <defaults>
</compile_context>

<pallas_src>
import jax
import jax.numpy as jnp
from jax.experimental import pallas as pl
from jax.experimental.pallas import tpu as pltpu


# ----------------------------- Pallas kernel --------------------------------
def eigen_fwd_kernel(gw_ref, gb_ref, wk_ref, ub_ref, out_ref):
    """out[b, f] = gw_flat[b, :] @ Wk[:, f]  +  gb[b, :] @ Ub[:, f].

    gw_ref: (TB, O*I) bf16    wk_ref: (O*I, Fp) bf16
    gb_ref: (TB, O)   bf16    ub_ref: (O,  Fp) bf16
    out_ref: (TB, Fp) f32  (Fp = F padded to a multiple of 128 -> lane-dense)
    """
    w_term = jnp.dot(gw_ref[...], wk_ref[...], preferred_element_type=jnp.float32)
    b_term = jnp.dot(gb_ref[...], ub_ref[...], preferred_element_type=jnp.float32)
    out_ref[...] = w_term + b_term


# --------------- one-time (model-setup) encode-factor precompute -------------
def precompute_encode_factors(encode):
    """Kronecker-combine per-axis encode factors; pad F to a lane-dense width.

    Returns (Wk, Ub) in bf16:
      Wk[o*I + i, f] = sum_r uw_out[o, r, f] * uw_in[i, r, f]     (O*I, Fp)
      Ub[o, f]       = sum_r ub[o, r, f]                          (O,   Fp)
    This is a property of the (fixed) encode parameters, not of the batch, so
    it is computed once per model, not per forward call.
    """
    uw_out, uw_in = encode["fc.weight"]          # (O, R, F), (I, R, F)
    ub = encode["fc.bias"][0]                    # (O, R, F)
    O, _, F = uw_out.shape
    I = uw_in.shape[0]
    f_pad = ((F + 127) // 128) * 128

    wk = jnp.einsum('orf,irf->oif', uw_out, uw_in,
                    precision='highest').reshape(O * I, F)         # f32
    ubs = jnp.sum(ub, axis=1)                                      # (O, F)

    wk = jnp.pad(wk, ((0, 0), (0, f_pad - F))).astype(jnp.bfloat16)
    ubs = jnp.pad(ubs, ((0, 0), (0, f_pad - F))).astype(jnp.bfloat16)
    return wk, ubs


# ------------------------------- wrapper --------------------------------------
def eigen_forward_pallas(gw, gb, wk, ubs, n_features, *, tb=128):
    """gw: (B, O, I) f32, gb: (B, O) f32, wk: (O*I, Fp) bf16, ubs: (O, Fp) bf16."""
    B, O, I = gw.shape
    OI, f_pad = wk.shape
    assert OI == O * I and ubs.shape == (O, f_pad)
    assert B % tb == 0, "batch must be divisible by the batch tile"
    assert tb % 16 == 0, "tb must be a multiple of 16 (bf16 sublane packing)"

    # Free reshape (contiguous trailing dims) + bf16 stream of the dominant
    # HBM traffic.  In a real pipeline the gradients would be produced in bf16.
    gw_flat = gw.reshape(B, O * I).astype(jnp.bfloat16)
    gb_b = gb.astype(jnp.bfloat16)

    out = pl.pallas_call(
        eigen_fwd_kernel,
        out_shape=jax.ShapeDtypeStruct((B, f_pad), jnp.float32),
        grid_spec=pltpu.PrefetchScalarGridSpec(
            num_scalar_prefetch=0,
            grid=(B // tb,),                       # keep >= 2 steps (v7x megacore)
            in_specs=[
                pl.BlockSpec((tb, O * I), lambda b: (b, 0)),   # weight grads (bf16)
                pl.BlockSpec((tb, O),     lambda b: (b, 0)),   # bias grads   (bf16)
                pl.BlockSpec((OI, f_pad), lambda b: (0, 0)),   # Kronecker factor
                pl.BlockSpec((O,  f_pad), lambda b: (0, 0)),   # bias factor (r-summed)
            ],
            out_specs=pl.BlockSpec((tb, f_pad), lambda b: (b, 0)),
        ),
        compiler_params=pltpu.CompilerParams(
            dimension_semantics=("parallel",),
            vmem_limit_bytes=32 * 1024 * 1024,     # safe on v5e/v6e/v7x; tiles ~1 MiB
        ),
    )(gw_flat, gb_b, wk, ubs)
    return out[:, :n_features]                     # drop lane padding


# ------------------ __init__ glue (plain JAX, deterministic) ----------------
def _construct_subnetworks(decode, n_features):
    nets = []
    for i in range(n_features):
        recon = {}
        for name, factors in decode.items():
            cur = factors[0][..., i]                               # (d0, R)
            for t in factors[1:]:
                cur = jnp.einsum('...r,wr->...wr', cur, t[..., i])
            recon[name] = jnp.sum(cur, axis=-1)                    # sum over r
        nets.append(recon)
    return nets


def _compute_norm(net):
    return sum(jnp.sqrt(jnp.sum(v ** 2)) for v in net.values()) ** 0.5


def normalize_low_ranks(decode, n_features, eps=1e-10):
    norms = jnp.stack([_compute_norm(n)
                       for n in _construct_subnetworks(decode, n_features)])  # (F,)
    out = {}
    for name, factors in decode.items():
        n_adaptors = len(factors)
        scale = norms ** (1.0 / n_adaptors) + eps                  # (F,), per feature
        out[name] = [t / scale for t in factors]                   # broadcasts over f
    return out


# --------------------------- pure-JAX reference ------------------------------
def forward_reference(gradients, encode):
    jvps = []
    for name, factors in encode.items():
        cur = jnp.einsum('...w,wrf->...rf', gradients[name], factors[-1],
                         precision='highest')
        for t in factors[-2::-1]:
            cur = jnp.einsum('...wrf,wrf->...rf', cur, t, precision='highest')
        jvps.append(jnp.sum(cur, axis=-2))                         # '... r f -> ... f'
    return sum(jvps)


# --------------------------------- main --------------------------------------
if __name__ == "__main__":
    O, I = 32, 16          # wrapped model: nn.Linear(I, O) -> weight (O, I), bias (O,)
    R, F = 2, 8            # reduced_dim, n_features
    B, TB = 256, 128       # gradient batch; batch tile (grid = 2 -> both v7x TCs)

    key = jax.random.PRNGKey(0)
    k_w0, k_w1, k_b0, k_gw, k_gb = jax.random.split(key, 5)

    # low_rank_decode: one (length, R, F) factor per dimension of each parameter,
    # init randn/n_features then normalized (as in __init__); encode = deepcopy.
    decode = {
        "fc.weight": [jax.random.normal(k_w0, (O, R, F), jnp.float32) / F,
                      jax.random.normal(k_w1, (I, R, F), jnp.float32) / F],
        "fc.bias":   [jax.random.normal(k_b0, (O, R, F), jnp.float32) / F],
    }
    decode = normalize_low_ranks(decode, F)
    encode = {k: list(v) for k, v in decode.items()}   # deepcopy equivalent (immutable)

    gradients = {
        "fc.weight": jax.random.normal(k_gw, (B, O, I), jnp.float32),
        "fc.bias":   jax.random.normal(k_gb, (B, O), jnp.float32),
    }

    # One-time factor precompute (Kronecker combine + r-sum + lane padding).
    wk, ubs = precompute_encode_factors(encode)

    out = eigen_forward_pallas(gradients["fc.weight"], gradients["fc.bias"],
                               wk, ubs, F, tb=TB)
    out = jax.block_until_ready(out)
    assert out.shape == (B, F), out.shape

    # (1) Matched-precision reference (same bf16-rounded inputs / factor combine):
    #     checks the kernel's matmul + padding plumbing tightly.
    gw16 = gradients["fc.weight"].reshape(B, O * I).astype(jnp.bfloat16).astype(jnp.float32)
    gb16 = gradients["fc.bias"].astype(jnp.bfloat16).astype(jnp.float32)
    ref_matched = (jnp.dot(gw16, wk.astype(jnp.float32), precision='highest')
                   + jnp.dot(gb16, ubs.astype(jnp.float32), precision='highest'))[:, :F]
    err_m = float(jnp.max(jnp.abs(out - ref_matched)))
    assert jnp.allclose(out, ref_matched, rtol=1e-3, atol=1e-3), err_m

    # (2) Full-precision module reference: loose tolerance for the bf16 stream.
    ref = forward_reference(gradients, encode)
    err = float(jnp.max(jnp.abs(out - ref)))
    assert jnp.allclose(out, ref, rtol=5e-2, atol=5e-2), err

    print("KERNEL_OK")
</pallas_src>

<mosaic_0001>
module attributes {stable_mosaic.version = 11 : i64} {
  func.func @eigen_fwd_kernel(%arg0: i32, %arg1: memref<128x512xbf16, #tpu.memory_space<vmem>>, %arg2: memref<128x32xbf16, #tpu.memory_space<vmem>>, %arg3: memref<512x128xbf16, #tpu.memory_space<vmem>>, %arg4: memref<32x128xbf16, #tpu.memory_space<vmem>>, %arg5: memref<128x128xf32, #tpu.memory_space<vmem>>) attributes {dimension_semantics = [#tpu.dimension_semantics<parallel>], iteration_bounds = array<i64: 2>, scalar_prefetch = 0 : i64, scratch_operands = 0 : i64, tpu.core_type = #tpu.core_type<tc>, window_params = [{transform_indices = @transform_0, window_bounds = array<i64: 128, 512>}, {transform_indices = @transform_1, window_bounds = array<i64: 128, 32>}, {pipeline_mode = #tpu.pipeline_mode<synchronous>, transform_indices = @transform_2, window_bounds = array<i64: 512, 128>}, {pipeline_mode = #tpu.pipeline_mode<synchronous>, transform_indices = @transform_3, window_bounds = array<i64: 32, 128>}, {transform_indices = @transform_4, window_bounds = array<i64: 128, 128>}]} {
    %c0 = arith.constant 0 : index
    %c0_0 = arith.constant 0 : index
    %0 = vector.load %arg1[%c0, %c0_0] : memref<128x512xbf16, #tpu.memory_space<vmem>>, vector<128x512xbf16>
    %c0_1 = arith.constant 0 : index
    %c0_2 = arith.constant 0 : index
    %1 = vector.load %arg3[%c0_1, %c0_2] : memref<512x128xbf16, #tpu.memory_space<vmem>>, vector<512x128xbf16>
    %cst = arith.constant dense<0.000000e+00> : vector<128x128xf32>
    %2 = tpu.matmul %0, %1, %cst {dimension_numbers = #tpu.dot_dimension_numbers<[1], [0], [0], [1], [0, 0, 1, 1], [], []>} : vector<128x512xbf16>, vector<512x128xbf16>, vector<128x128xf32> -> vector<128x128xf32>
    %c0_3 = arith.constant 0 : index
    %c0_4 = arith.constant 0 : index
    %3 = vector.load %arg2[%c0_3, %c0_4] : memref<128x32xbf16, #tpu.memory_space<vmem>>, vector<128x32xbf16>
    %c0_5 = arith.constant 0 : index
    %c0_6 = arith.constant 0 : index
    %4 = vector.load %arg4[%c0_5, %c0_6] : memref<32x128xbf16, #tpu.memory_space<vmem>>, vector<32x128xbf16>
    %cst_7 = arith.constant dense<0.000000e+00> : vector<128x128xf32>
    %5 = tpu.matmul %3, %4, %cst_7 {dimension_numbers = #tpu.dot_dimension_numbers<[1], [0], [0], [1], [0, 0, 1, 1], [], []>} : vector<128x32xbf16>, vector<32x128xbf16>, vector<128x128xf32> -> vector<128x128xf32>
    %6 = arith.addf %2, %5 : vector<128x128xf32>
    %c0_8 = arith.constant 0 : index
    %c0_9 = arith.constant 0 : index
    %7 = vector.load %arg5[%c0_8, %c0_9] : memref<128x128xf32, #tpu.memory_space<vmem>>, vector<128x128xf32>
    tpu.vector_store %arg5[%c0_8, %c0_9], %6 {strides = array<i32>} : memref<128x128xf32, #tpu.memory_space<vmem>>, vector<128x128xf32>,
    return
  }
  func.func @transform_0(%arg0: i32) -> (i32, i32) {
    %c0_i32 = arith.constant 0 : i32
    %c0_i32_0 = arith.constant 0 : i32
    return %arg0, %c0_i32 : i32, i32
  }
  func.func @transform_1(%arg0: i32) -> (i32, i32) {
    %c0_i32 = arith.constant 0 : i32
    %c0_i32_0 = arith.constant 0 : i32
    return %arg0, %c0_i32 : i32, i32
  }
  func.func @transform_2(%arg0: i32) -> (i32, i32) {
    %c0_i32 = arith.constant 0 : i32
    %c0_i32_0 = arith.constant 0 : i32
    %c0_i32_1 = arith.constant 0 : i32
    return %c0_i32, %c0_i32_0 : i32, i32
  }
  func.func @transform_3(%arg0: i32) -> (i32, i32) {
    %c0_i32 = arith.constant 0 : i32
    %c0_i32_0 = arith.constant 0 : i32
    %c0_i32_1 = arith.constant 0 : i32
    return %c0_i32, %c0_i32_0 : i32, i32
  }
  func.func @transform_4(%arg0: i32) -> (i32, i32) {
    %c0_i32 = arith.constant 0 : i32
    %c0_i32_0 = arith.constant 0 : i32
    return %arg0, %c0_i32 : i32, i32
  }
}

</mosaic_0001>

<bundles_post_ra>
// kernel: tpu_custom_call.1
= control target key start
LH: loop header
LB: loop body
LE: loop exit
PB: predicated region body
PF: predicated region fallthrough
CT: control target
= control target key end

     0   :  { %9 = vsyncpa [#allocation3], 0  ;;  %s2101_s0 = inlined_call_operand.hbm [shape: bf16[256,512], index: 0, kind: input, shape index: {}]   ;;  %s2102_s1 = inlined_call_operand.vmem [shape: bf16[256,32], index: 1, kind: input, shape index: {}]   ;;  %s2103_s2 = inlined_call_operand.hbm [shape: bf16[512,128], index: 2, kind: input, shape index: {}]   ;;  %s2104_s3 = inlined_call_operand.vmem [shape: bf16[32,128], index: 3, kind: input, shape index: {}]   ;;  %s2105_s4 = inlined_call_operand.hbm [shape: f32[256,128], index: 4, kind: output, shape index: {}]  }
   0x1   :  { %11 = vsyncpa [#allocation3 + $0x1], 0 }
   0x2   :  { %12 = vsyncpa [#allocation6], 0 }
   0x3   :  { %13 = vsyncpa [#allocation4], 0 }
   0x4   :  { %15 = vsyncpa [#allocation4 + $0x1], 0  ;;  %s1811_s15 = smov 0   ;;  %s1813_s16 = smov 0  }
   0x5   :  { %s1815_s17 = smov 0   ;;  %s1817_s18 = smov 0  }
   0x6 LB: > { %s1832_s19 = sadd.s32 4294967295, %s1777_s18   ;;  %s1178_s20 = sadd.s32 4294967294, %s1777_s18   ;;  %s1777_s18 = sphi %s1817_s18, %s2115_s18   ;;  %s1773_s17 = sphi %s1815_s17, %s2114_s17   ;;  %s1769_s16 = sphi %s1813_s16, %s2113_s16   ;;  %s1765_s15 = sphi %s1811_s15, %s2112_s15  }
   0x7   : > { %p41_p0 = scmp.ne.s32.totalorder %s1769_s16, %s1765_s15  ;;  %p42_p1 = scmp.eq.s32.totalorder %s1832_s19, 0 }
   0x8   : > { %p133_p2 = scmp.eq.s32.totalorder %s1832_s19, 1  ;;  %p139_p3 = scmp.eq.s32.totalorder %s1178_s20, 1 }
   0x9   : > { %p1841_p4 = por %p42_p1, %p41_p0  ;;  %p1179_p5 = scmp.ge.s32.totalorder %s1777_s18, 1 }
   0xa   : > { %p1846_p6 = por %p139_p3, %p41_p0  ;;  %p146_p7 = scmp.lt.s32.totalorder %s1777_s18, 3 }
   0xb   : > { %s157_s25 = sshll.u32 %s2103_s2, 4  ;;  %s1779_s27 = smov [#allocation5]   ;;  %s158_s25 = int_to_ptr.hbm [resolvable:$true] %s157_s25 }
   0xc   : > { %p1854_p8 = pnand %p1179_p5, %p146_p7  ;;  %s159_s28 = sshll.u32 %s1779_s27, 4  ;;  %s160_s28 = int_to_ptr.vmem [resolvable:$true] %s159_s28 }
   0xd   : > { %s1864_s29 = sadd.s32 1, %s1777_s18   ;;  %s1780_s30 = smov 64  }
   0xe   : > { %p1592_p9 = pneg %p1854_p8  ;;  %s1781_s5 = smov 4  }
   0xf   : > { %s25_s6 = ssub.s32 %s1777_s18, %s1864_s29  ;;  %s28_s7 = sadd.s32 1, %s1773_s17 }
  0x10   : > { %p1593_p10 = pnand %p1592_p9, %p42_p1  ;;  %p26_p12 = scmp.eq.s32.totalorder %s25_s6, 0 }
  0x11   : > { %p35_p13 = scmp.ne.s32.totalorder %s1773_s17, %s1769_s16  ;;  %p36_p0 = scmp.eq.s32.totalorder %s1777_s18, 0 }
  0x12   : > { %1595 = dma.hbm_to_vmem [thread:$0]  (!%p1593_p10), %s158_s25, 4096, %s160_s28, [#allocation6], %s1780_s30, %s1780_s30, %s1781_s5  }
  0x13   : > { %p1605_p3 = scmp.lt.s32.totalorder %s1777_s18, 2  ;;  %p37_p5 = por %p36_p0, %p35_p13 }
  0x14   : > { %s1874_s8 = scalar_select %p26_p12, %s1773_s17, %s28_s7  }
  0x15   : > { %p1878_p7 = por %p133_p2, %p35_p13  ;;  %s176_s10 = sand.u32 1, %s1773_s17  }
  0x16   : > { %s1502_s11 = sshll.u32 %s1777_s18, 8  ;;  %s1182_s12 = sshll.u32 %s176_s10, 8 }
  0x17   : > { %s186_s20 = scalar_lea.hbm %s2101_s0, %s1502_s11  ;;  %s180_s24 = scalar_lea.vmem [#allocation2], %s1182_s12 }
  0x18   : > { %s187_s23 = sshll.u32 %s186_s20, 4  ;;  %s189_s25 = sshll.u32 %s180_s24, 4  ;;  %s188_s23 = int_to_ptr.hbm [resolvable:$true] %s187_s23  ;;  %s190_s25 = int_to_ptr.vmem [resolvable:$true] %s189_s25 }
  0x19   : > { %p1889_p9 = pnand %p1605_p3, %p37_p5  ;;  %s177_s28 = scalar_lea.sflag [#allocation3], %s176_s10 }
  0x1a   : > { %s1677_s30 = sshra.s32 %s188_s23, 4  ;;  %s1684_s11 = scalar_lea.hbm %s2101_s0, 512  ;;  %s1678_s30 = int_to_ptr.hbm [resolvable:$true] %s1677_s30 }
  0x1b   : > { %s1679_s5 = scalar_lea.hbm %s1678_s30, 256  ;;  %p1681_p10 = pneg %p1889_p9 }
  0x1c   : > { %p1680_p2 = scmp.ne.s32.totalorder %s1678_s30, %s1679_s5  ;;  %p1685_p0 = scmp.lt.s32.totalorder %s1678_s30, %s2101_s0 }
  0x1d   : > { %p1686_p3 = scmp.lt.s32.totalorder %s1684_s11, %s1679_s5 }
  0x1e   : > { %p1682_p12 = pnand %p1681_p10, %p1680_p2 }
  0x1f   : > { %p1687_p5 = por %p1686_p3, %p1685_p0 }
  0x20   : > { %p1683_p13 = pneg %p1682_p12 }
  0x22   : > { %p1688_p11 = pnand %p1687_p5, %p1683_p13 }
  0x24   : > { %1691 = shalt.err (!%p1688_p11)
}
  0x25   : > { %s1782_s10 = smov 256   ;;  %s1783_s14 = smov 16  }
  0x26   : > { %1599 = dma.hbm_to_vmem [thread:$0]  (!%p1889_p9), %s188_s23, 4096, %s190_s25, %s177_s28, %s1782_s10, %s1782_s10, %s1783_s14  }
  0x27   : > { %210 = sbr.rel (%p1854_p8) target bundleno = 365 (0x16d), region = 36  ;;  %s1906_s20 = sand.u32 (!%p1854_p8), 1, %s1769_s16  }
  0x28   : > { %s1187_s24 = sshll.u32 (!%p1854_p8), %s1906_s20, 8  ;;  %s213_s30 = scalar_lea.sflag (!%p1854_p8), [#allocation3], %s1906_s20 }
  0x29   : > { %s1910_s5 = scalar_lea.vmem (!%p1854_p8), [#allocation2], %s1187_s24 }
  0x2c   : > { %1752 = dma.done.wait (%p1841_p4), %s213_s30, 4096  }
  0x2d   : > { %1754 = vsyncadd (%p1841_p4), %s213_s30, 4294963200 }
  0x2e   : > { %1756 = dma.done.wait (%p42_p1), [#allocation6], 4096  }
  0x2f   : > { %1758 = vsyncadd (%p42_p1), [#allocation6], 4294963200  ;;  %s1190_s26 = sshll.u32 %s1832_s19, 4  ;;  %v1576_v0 = vld [vmem:[%s2104_s3 + $0x8] sm:$0xff]  ;;  %v1575_v1 = vld [vmem:[%s2104_s3] sm:$0xff]  ;;  %vm429_vm0 = vcmask 261120  }
  0x30   : > { %p254_p8 = scmp.lt.s32.totalorder %s1190_s26, 31  ;;  %1578 = vmatpush.bf16.msra.mxu1 %v1576_v0  ;;  %1579 = vmatpush.bf16.msra.mxu2 %v1576_v0  ;;  %v1550_v2 = vld [vmem:[#allocation5 + $0x78] sm:$0xff]  ;;  %v1541_v8 = vld [vmem:[#allocation5 + $0x30] sm:$0xff]  ;;  %v1540_v14 = vld [vmem:[#allocation5 + $0x28] sm:$0xff]  ;;  %s1189_s12 = sshll.u32 %s1906_s20, 7 }
  0x31   : > { %v1542_v3 = vld [vmem:[#allocation5 + $0x38] sm:$0xff]  ;;  %1580 = vmatpush.bf16.msra.mxu3 %v1576_v0  ;;  %460 = vmatpush.bf16.msra.mxu0 %v1576_v0  ;;  %v1549_v9 = vld [vmem:[#allocation5 + $0x70] sm:$0xff]  ;;  %v1548_v15 = vld [vmem:[#allocation5 + $0x68] sm:$0xff]  ;;  %s2037_s13 = scalar_lea.vmem [#allocation7], %s1189_s12  ;;  %s1577_s10 = sshll.u32 %s1832_s19, 7 }
  0x32   : > { %s2117_s26 = smov (!%p254_p8, %s1190_s26), 31  ;;  %v1558_v6 = vld [vmem:[#allocation5 + $0xb8] sm:$0xff]  ;;  %v1557_v12 = vld [vmem:[#allocation5 + $0xb0] sm:$0xff]  ;;  %v1556_v16 = vld [vmem:[#allocation5 + $0xa8] sm:$0xff]  ;;  %s1079_s30 = scalar_lea.hbm %s2105_s4, %s1577_s10 }
  0x33   : > { %s1191_s23 = sshll.u32 %s2117_s26, 2  ;;  %v1566_v7 = vld [vmem:[#allocation5 + $0xf8] sm:$0xff]  ;;  %v1565_v13 = vld [vmem:[#allocation5 + $0xf0] sm:$0xff]  ;;  %v1564_v17 = vld [vmem:[#allocation5 + $0xe8] sm:$0xff]  ;;  %s1082_s26 = sshll.u32 %s1079_s30, 4  ;;  %s1083_s26 = int_to_ptr.hbm [resolvable:$true] %s1082_s26 }
  0x34   : > { %s1930_s11 = scalar_lea.vmem %s2102_s1, %s1191_s23  ;;  %1581 = vmatpush.bf16.msra.mxu1 %v1575_v1  ;;  %1582 = vmatpush.bf16.msra.mxu2 %v1575_v1  ;;  %v1539_v18 = vld [vmem:[#allocation5 + $0x20] sm:$0xff]  ;;  %v1538_v22 = vld [vmem:[#allocation5 + $0x18] sm:$0xff]  ;;  %v1537_v28 = vld [vmem:[#allocation5 + $0x10] sm:$0xff]  ;;  %s1068_s19 = scalar_lea.sflag [#allocation4], %s1906_s20 }
  0x35   : > { %v1569_v4 = vld [vmem:[%s1930_s11 + $0x10] sm:$0xff]  ;;  %v1571_v5 = vld [vmem:[%s1930_s11 + $0x20] sm:$0xff]  ;;  %1583 = vmatpush.bf16.msra.mxu3 %v1575_v1  ;;  %461 = vmatpush.bf16.msra.mxu0 %v1575_v1  ;;  %v1574_v11 = vld [vmem:[%s1930_s11 + $0x38] sm:$0xff]  ;;  %s1721_s23 = sshra.s32 %s1083_s26, 4  ;;  %s1727_s21 = scalar_lea.hbm %s2105_s4, 256  ;;  %s1722_s23 = int_to_ptr.hbm [resolvable:$true] %s1721_s23 }
  0x36   : > { %v1567_v10 = vld [vmem:[%s1930_s11] sm:$0xff]  ;;  %v1546_v23 = vld [vmem:[#allocation5 + $0x58] sm:$0xff]  ;;  %v1572_v25 = vld [vmem:[%s1930_s11 + $0x28] sm:$0xff]  ;;  %s1723_s25 = scalar_lea.hbm %s1722_s23, 128  ;;  %p1728_p9 = scmp.lt.s32.totalorder %s1722_s23, %s2105_s4 }
  0x37   : > { %1234 = vmatmul.msk.bf16.vlgmr.msra.gmra.mxu1 %vm429_vm0, %v1569_v4  ;;  %1236 = vmatmul.msk.bf16.vlgmr.msra.gmra.mxu2 %vm429_vm0, %v1571_v5  ;;  %v1547_v19 = vld [vmem:[#allocation5 + $0x60] sm:$0xff]  ;;  %v1570_v24 = vld [vmem:[%s1930_s11 + $0x18] sm:$0xff]  ;;  %v1545_v29 = vld [vmem:[#allocation5 + $0x50] sm:$0xff]  ;;  %p1724_p1 = scmp.ne.s32.totalorder %s1722_s23, %s1723_s25  ;;  %p1729_p2 = scmp.lt.s32.totalorder %s1727_s21, %s1723_s25 }
  0x38   : > { %904 = vmatpush.bf16.msrb.mxu2 %v1550_v2  ;;  %855 = vmatpush.bf16.msrb.mxu1 %v1542_v3  ;;  %v1555_v20 = vld [vmem:[#allocation5 + $0xa0] sm:$0xff]  ;;  %v1554_v26 = vld [vmem:[#allocation5 + $0x98] sm:$0xff]  ;;  %v1568_v30 = vld [vmem:[%s1930_s11 + $0x8] sm:$0xff] }
  0x39   : > { %953 = vmatpush.bf16.msrb.mxu3 %v1558_v6  ;;  %1002 = vmatpush.bf16.msrb.mxu0 %v1566_v7  ;;  %v1563_v21 = vld [vmem:[#allocation5 + $0xe0] sm:$0xff]  ;;  %v1562_v27 = vld [vmem:[#allocation5 + $0xd8] sm:$0xff]  ;;  %v1553_v31 = vld [vmem:[#allocation5 + $0x90] sm:$0xff]  ;;  %p1725_p4 = pnand %p1724_p1, %p1878_p7  ;;  %p1730_p10 = por %p1729_p2, %p1728_p9 }
  0x3a   : > { %1232 = vmatmul.msk.bf16.vlgmr.msra.gmra.mxu0 %vm429_vm0, %v1567_v10  ;;  %1239 = vmatmul.msk.bf16.vlgmr.msra.gmra.mxu3 %vm429_vm0, %v1574_v11  ;;  %v1561_v32 = vld [vmem:[#allocation5 + $0xd0] sm:$0xff]  ;;  %v1536_v33 = vld [vmem:[#allocation5 + $0x8] sm:$0xff]  ;;  %v1535_v37 = vld [vmem:[#allocation5] sm:$0xff] }
  0x3b   : > { %v1544_v34 = vld [vmem:[#allocation5 + $0x48] sm:$0xff]  ;;  %v1543_v38 = vld [vmem:[#allocation5 + $0x40] sm:$0xff]  ;;  %v1505_v40 = vld [vmem:[%s1910_s5 + $0xc] sm:$0xf0]  ;;  %p1726_p11 = pneg %p1725_p4 }
  0x3c   : > { %856 = vmatpush.bf16.msrb.mxu1 %v1541_v8  ;;  %905 = vmatpush.bf16.msrb.mxu2 %v1549_v9  ;;  %v1552_v35 = vld [vmem:[#allocation5 + $0x88] sm:$0xff]  ;;  %v1242_v39 = vld [vmem:[%s1910_s5] sm:$0xf]  ;;  %v1506_v44 = vld [vmem:[%s1910_s5 + $0x14] sm:$0xf0] }
  0x3d   : > { %954 = vmatpush.bf16.msrb.mxu3 %v1557_v12  ;;  %1003 = vmatpush.bf16.msrb.mxu0 %v1565_v13  ;;  %v1560_v36 = vld [vmem:[#allocation5 + $0xc8] sm:$0xff]  ;;  %v1551_v41 = vld [vmem:[#allocation5 + $0x80] sm:$0xff]  ;;  %v1573_v45 = vld [vmem:[%s1930_s11 + $0x30] sm:$0xff]  ;;  %v1243_v46 = vor.u32 %v1505_v40, %v1242_v39  ;;  %p1731_p12 = pnand %p1730_p10, %p1726_p11 }
  0x3e   : > { %v1559_v42 = vld [vmem:[#allocation5 + $0xc0] sm:$0xff]  ;;  %v1250_v43 = vld [vmem:[%s1910_s5 + $0x8] sm:$0xf]  ;;  %v1504_v47 = vld [vmem:[%s1910_s5 + $0xc] sm:$0xf] }
  0x3f   : > { %v1252_v48 = vld [vmem:[%s1910_s5 + $0x18] sm:$0xf0]  ;;  %v1251_v49 = vor.u32 %v1506_v44, %v1250_v43  ;;  %v1258_v51 = vld [vmem:[%s1910_s5 + $0x20] sm:$0xf]  ;;  %v1509_v52 = vld [vmem:[%s1910_s5 + $0x2c] sm:$0xf0] }
  0x40   : > { %857 = vmatpush.bf16.msrb.mxu1 %v1540_v14  ;;  %906 = vmatpush.bf16.msrb.mxu2 %v1548_v15  ;;  %v1255_v50 = vor.u32 %v1504_v47, %v1252_v48  ;;  %v1503_v53 = vld [vmem:[%s1910_s5 + $0x4] sm:$0xf]  ;;  %v1244_v54 = vld [vmem:[%s1910_s5 + $0x10] sm:$0xf0]  ;;  %v1266_v55 = vld [vmem:[%s1910_s5 + $0x28] sm:$0xf]  ;;  %v1259_v57 = vor.u32 %v1509_v52, %v1258_v51 }
  0x41   : > { %955 = vmatpush.bf16.msrb.mxu3 %v1556_v16  ;;  %1004 = vmatpush.bf16.msrb.mxu0 %v1564_v17  ;;  %v1510_v56 = vld [vmem:[%s1910_s5 + $0x34] sm:$0xf0]  ;;  %v1247_v58 = vor.u32 %v1503_v53, %v1244_v54  ;;  %v1508_v59 = vld [vmem:[%s1910_s5 + $0x2c] sm:$0xf]  ;;  %v1268_v60 = vld [vmem:[%s1910_s5 + $0x38] sm:$0xf0] }
  0x42   : > { %v1267_v61 = vor.u32 %v1510_v56, %v1266_v55  ;;  %v1271_v62 = vor.u32 %v1508_v59, %v1268_v60  ;;  %v1274_v63 = vld [vmem:[%s1910_s5 + $0x40] sm:$0xf]  ;;  %v1513_v0 = vld [vmem:[%s1910_s5 + $0x4c] sm:$0xf0]  ;;  %v1507_v1 = vld [vmem:[%s1910_s5 + $0x24] sm:$0xf] }
  0x43   : > { %v1260_v2 = vld [vmem:[%s1910_s5 + $0x30] sm:$0xf0]  ;;  %v1282_v3 = vld [vmem:[%s1910_s5 + $0x48] sm:$0xf]  ;;  %v1514_v4 = vld [vmem:[%s1910_s5 + $0x54] sm:$0xf0]  ;;  %v1275_v5 = vor.u32 %v1513_v0, %v1274_v63 }
  0x44   : > { %858 = vmatpush.bf16.msrb.mxu1 %v1539_v18  ;;  %907 = vmatpush.bf16.msrb.mxu2 %v1547_v19  ;;  %v1263_v6 = vor.u32 %v1507_v1, %v1260_v2  ;;  %v1512_v7 = vld [vmem:[%s1910_s5 + $0x4c] sm:$0xf]  ;;  %v1284_v8 = vld [vmem:[%s1910_s5 + $0x58] sm:$0xf0]  ;;  %v1283_v9 = vor.u32 %v1514_v4, %v1282_v3  ;;  %v1290_v11 = vld [vmem:[%s1910_s5 + $0x60] sm:$0xf] }
  0x45   : > { %956 = vmatpush.bf16.msrb.mxu3 %v1555_v20  ;;  %1005 = vmatpush.bf16.msrb.mxu0 %v1563_v21  ;;  %v1287_v10 = vor.u32 %v1512_v7, %v1284_v8  ;;  %v1517_v12 = vld [vmem:[%s1910_s5 + $0x6c] sm:$0xf0]  ;;  %v1511_v13 = vld [vmem:[%s1910_s5 + $0x44] sm:$0xf]  ;;  %v1276_v14 = vld [vmem:[%s1910_s5 + $0x50] sm:$0xf0] }
  0x46   : > { %v1298_v15 = vld [vmem:[%s1910_s5 + $0x68] sm:$0xf]  ;;  %v1518_v16 = vld [vmem:[%s1910_s5 + $0x74] sm:$0xf0]  ;;  %v1291_v17 = vor.u32 %v1517_v12, %v1290_v11  ;;  %v1279_v18 = vor.u32 %v1511_v13, %v1276_v14  ;;  %v1516_v19 = vld [vmem:[%s1910_s5 + $0x6c] sm:$0xf] }
  0x47   : > { %1235 = vmatmul.msk.bf16.gmra.mxu1 %vm429_vm0, %v1570_v24  ;;  %1237 = vmatmul.msk.bf16.gmra.mxu2 %vm429_vm0, %v1572_v25  ;;  %v1300_v20 = vld [vmem:[%s1910_s5 + $0x78] sm:$0xf0]  ;;  %v1299_v21 = vor.u32 %v1518_v16, %v1298_v15  ;;  %v1521_v24 = vld [vmem:[%s1910_s5 + $0x8c] sm:$0xf0]  ;;  %v1515_v25 = vld [vmem:[%s1910_s5 + $0x64] sm:$0xf] }
  0x48   : > { %859 = vmatpush.bf16.msrb.mxu1 %v1538_v22  ;;  %908 = vmatpush.bf16.msrb.mxu2 %v1546_v23  ;;  %v1303_v22 = vor.u32 %v1516_v19, %v1300_v20  ;;  %v1306_v23 = vld [vmem:[%s1910_s5 + $0x80] sm:$0xf]  ;;  %v1330_v39 = vld [vmem:[%s1910_s5 + $0xa8] sm:$0xf]  ;;  %v1526_v40 = vld [vmem:[%s1910_s5 + $0xb4] sm:$0xf0] }
  0x49   : > { %957 = vmatpush.bf16.msrb.mxu3 %v1554_v26  ;;  %1006 = vmatpush.bf16.msrb.mxu0 %v1562_v27  ;;  %v1292_v26 = vld [vmem:[%s1910_s5 + $0x70] sm:$0xf0]  ;;  %v1314_v27 = vld [vmem:[%s1910_s5 + $0x88] sm:$0xf]  ;;  %v1524_v43 = vld [vmem:[%s1910_s5 + $0xac] sm:$0xf] }
  0x4a   : > { %1233 = vmatmul.msk.bf16.gmra.mxu0 %vm429_vm0, %v1568_v30  ;;  %v1295_v30 = vor.u32 %v1515_v25, %v1292_v26  ;;  %v1332_v44 = vld [vmem:[%s1910_s5 + $0xb8] sm:$0xf0]  ;;  %v1338_v47 = vld [vmem:[%s1910_s5 + $0xc0] sm:$0xf]  ;;  %v1529_v48 = vld [vmem:[%s1910_s5 + $0xcc] sm:$0xf0] }
  0x4b   : > { %v1346_v51 = vld [vmem:[%s1910_s5 + $0xc8] sm:$0xf]  ;;  %v1530_v52 = vld [vmem:[%s1910_s5 + $0xd4] sm:$0xf0]  ;;  %v1339_v53 = vor.u32 %v1529_v48, %v1338_v47  ;;  %v1528_v55 = vld [vmem:[%s1910_s5 + $0xcc] sm:$0xf] }
  0x4c   : > { %860 = vmatpush.bf16.msrb.mxu1 %v1537_v28  ;;  %909 = vmatpush.bf16.msrb.mxu2 %v1545_v29  ;;  %v1522_v28 = vld [vmem:[%s1910_s5 + $0x94] sm:$0xf0]  ;;  %v1307_v29 = vor.u32 %v1521_v24, %v1306_v23  ;;  %v1348_v56 = vld [vmem:[%s1910_s5 + $0xd8] sm:$0xf0]  ;;  %v1354_v63 = vld [vmem:[%s1910_s5 + $0xe0] sm:$0xf] }
  0x4d   : > { %958 = vmatpush.bf16.msrb.mxu3 %v1553_v31  ;;  %1007 = vmatpush.bf16.msrb.mxu0 %v1561_v32  ;;  %v1520_v31 = vld [vmem:[%s1910_s5 + $0x8c] sm:$0xf]  ;;  %v1316_v32 = vld [vmem:[%s1910_s5 + $0x98] sm:$0xf0]  ;;  %v1351_v59 = vor.u32 %v1528_v55, %v1348_v56  ;;  %v1533_v1 = vld [vmem:[%s1910_s5 + $0xec] sm:$0xf0] }
  0x4e   : > { %v1527_v2 = vld [vmem:[%s1910_s5 + $0xc4] sm:$0xf]  ;;  %v1340_v3 = vld [vmem:[%s1910_s5 + $0xd0] sm:$0xf0]  ;;  %v1362_v4 = vld [vmem:[%s1910_s5 + $0xe8] sm:$0xf]  ;;  %v1355_v7 = vor.u32 %v1533_v1, %v1354_v63 }
  0x4f   : > { %v1343_v8 = vor.u32 %v1527_v2, %v1340_v3  ;;  %v1531_v19 = vld [vmem:[%s1910_s5 + $0xe4] sm:$0xf]  ;;  %v1356_v20 = vld [vmem:[%s1910_s5 + $0xf0] sm:$0xf0] }
  0x50   : > { %861 = vmatpush.bf16.msrb.mxu1 %v1536_v33  ;;  %910 = vmatpush.bf16.msrb.mxu2 %v1544_v34  ;;  %v1315_v33 = vor.u32 %v1522_v28, %v1314_v27  ;;  %v1319_v34 = vor.u32 %v1520_v31, %v1316_v32  ;;  %v1359_v23 = vor.u32 %v1531_v19, %v1356_v20 }
  0x51   : > { %959 = vmatpush.bf16.msrb.mxu3 %v1552_v35  ;;  %1008 = vmatpush.bf16.msrb.mxu0 %v1560_v36  ;;  %v1322_v35 = vld [vmem:[%s1910_s5 + $0xa0] sm:$0xf]  ;;  %v1525_v36 = vld [vmem:[%s1910_s5 + $0xac] sm:$0xf0] }
  0x54   : > { %862 = vmatpush.bf16.msrb.mxu1 %v1535_v37  ;;  %911 = vmatpush.bf16.msrb.mxu2 %v1543_v38  ;;  %v1519_v37 = vld [vmem:[%s1910_s5 + $0x84] sm:$0xf]  ;;  %v1308_v38 = vld [vmem:[%s1910_s5 + $0x90] sm:$0xf0] }
  0x55   : > { %960 = vmatpush.bf16.msrb.mxu3 %v1551_v41  ;;  %1009 = vmatpush.bf16.msrb.mxu0 %v1559_v42  ;;  %v1323_v41 = vor.u32 %v1525_v36, %v1322_v35  ;;  %v1311_v42 = vor.u32 %v1519_v37, %v1308_v38 }
  0x57   : > { %1238 = vmatmul.msk.bf16.gmra.mxu2 %vm429_vm0, %v1573_v45  ;;  %863 = vmatmul.bf16.vlgmr.msrb.gmra.mxu1 %v1243_v46  ;;  %v1331_v45 = vor.u32 %v1526_v40, %v1330_v39  ;;  %v1335_v46 = vor.u32 %v1524_v43, %v1332_v44 }
  0x58   : > { %961 = vmatmul.bf16.vlgmr.msrb.gmra.mxu3 %v1251_v49  ;;  %v1523_v49 = vld [vmem:[%s1910_s5 + $0xa4] sm:$0xf] }
  0x5a   : > { %1010 = vmatmul.bf16.vlgmr.msrb.gmra.mxu0 %v1255_v50  ;;  %v1324_v50 = vld [vmem:[%s1910_s5 + $0xb0] sm:$0xf0] }
  0x5b   : > { %v1327_v54 = vor.u32 %v1523_v49, %v1324_v50 }
  0x67   : > { %868 = vmatmul.bf16.gmra.mxu1 %v1259_v57  ;;  %912 = vmatmul.bf16.vlgmr.msrb.gmra.mxu2 %v1247_v58  ;;  %v1347_v58 = vor.u32 %v1530_v52, %v1346_v51 }
  0x68   : > { %966 = vmatmul.bf16.gmra.mxu3 %v1267_v61 }
  0x6a   : > { %1015 = vmatmul.bf16.gmra.mxu0 %v1271_v62 }
  0x77   : > { %873 = vmatmul.bf16.gmra.mxu1 %v1275_v5  ;;  %917 = vmatmul.bf16.gmra.mxu2 %v1263_v6  ;;  %v1534_v5 = vld [vmem:[%s1910_s5 + $0xf4] sm:$0xf0] }
  0x78   : > { %971 = vmatmul.bf16.gmra.mxu3 %v1283_v9  ;;  %v1532_v9 = vld [vmem:[%s1910_s5 + $0xec] sm:$0xf]  ;;  %v1363_v12 = vor.u32 %v1534_v5, %v1362_v4 }
  0x7a   : > { %1020 = vmatmul.bf16.gmra.mxu0 %v1287_v10  ;;  %v1364_v10 = vld [vmem:[%s1910_s5 + $0xf8] sm:$0xf0]  ;;  %s1080_s5 = sshll.u32 %s2037_s13, 4  ;;  %s1081_s5 = int_to_ptr.vmem [resolvable:$true] %s1080_s5 }
  0x7b   : > { %v1367_v13 = vor.u32 %v1532_v9, %v1364_v10 }
  0x87   : > { %878 = vmatmul.bf16.gmra.mxu1 %v1291_v17  ;;  %922 = vmatmul.bf16.gmra.mxu2 %v1279_v18 }
  0x88   : > { %976 = vmatmul.bf16.gmra.mxu3 %v1299_v21 }
  0x8a   : > { %1025 = vmatmul.bf16.gmra.mxu0 %v1303_v22 }
  0x97   : > { %883 = vmatmul.bf16.gmra.mxu1 %v1307_v29  ;;  %927 = vmatmul.bf16.gmra.mxu2 %v1295_v30 }
  0x98   : > { %981 = vmatmul.bf16.gmra.mxu3 %v1315_v33 }
  0x9a   : > { %1030 = vmatmul.bf16.gmra.mxu0 %v1319_v34 }
  0xa7   : > { %888 = vmatmul.bf16.gmra.mxu1 %v1323_v41  ;;  %932 = vmatmul.bf16.gmra.mxu2 %v1311_v42 }
  0xa8   : > { %986 = vmatmul.bf16.gmra.mxu3 %v1331_v45 }
  0xaa   : > { %1035 = vmatmul.bf16.gmra.mxu0 %v1335_v46 }
  0xb4   : > { %v2002_v57 = vpop.f32.mrf.mxu1 }
  0xb7   : > { %893 = vmatmul.bf16.gmra.mxu1 %v1339_v53  ;;  %937 = vmatmul.bf16.gmra.mxu2 %v1327_v54  ;;  %v463_v60 = vpop.f32.mrf.mxu0 }
  0xb8   : > { %991 = vmatmul.bf16.gmra.mxu3 %v1347_v58 }
  0xba   : > { %v2004_v61 = vpop.f32.mrf.mxu2  ;;  %1040 = vmatmul.bf16.gmra.mxu0 %v1351_v59 }
  0xbc   : > { %v2006_v62 = vpop.f32.mrf.mxu1 }
  0xbd   : > { %v2020_v14 = vpop.f32.mrf.mxu3 }
  0xbf   : > { %v465_v0 = vpop.f32.mrf.mxu0 }
  0xc2   : > { %v2014_v6 = vpop.f32.mrf.mxu2 }
  0xc4   : > { %v2018_v11 = vpop.f32.mrf.mxu1 }
  0xc5   : > { %v2028_v21 = vpop.f32.mrf.mxu3 }
  0xc7   : > { %898 = vmatmul.bf16.gmra.mxu1 %v1355_v7  ;;  %942 = vmatmul.bf16.gmra.mxu2 %v1343_v8  ;;  %v468_v15 = vpop.f32.mrf.mxu0 }
  0xc8   : > { %996 = vmatmul.bf16.gmra.mxu3 %v1363_v12 }
  0xca   : > { %v2022_v16 = vpop.f32.mrf.mxu2  ;;  %1045 = vmatmul.bf16.gmra.mxu0 %v1367_v13 }
  0xcc   : > { %v2024_v17 = vpop.f32.mrf.mxu1 }
  0xcf   : > { %v470_v18 = vpop.f32.mrf.mxu0 }
  0xd2   : > { %v2030_v22 = vpop.f32.mrf.mxu2 }
  0xd4   : > { %v864_v24 = vpop.f32.mrf.mxu1 }
  0xd5   : > { %v865_v34 = vadd.f32 %v864_v24, %v463_v60 }
  0xd7   : > { %947 = vmatmul.bf16.gmra.mxu2 %v1359_v23  ;;  %v1011_v25 = vpop.f32.mrf.mxu0 }
  0xda   : > { %v2032_v26 = vpop.f32.mrf.mxu2 }
  0xdb   : > { %v962_v27 = vpop.f32.mrf.mxu3 }
  0xdc   : > { %v866_v28 = vpop.f32.mrf.mxu1 }
  0xdd   : > { %v867_v42 = vadd.f32 %v866_v28, %v465_v0 }
  0xdf   : > { %v1013_v29 = vpop.f32.mrf.mxu0 }
  0xe2   : > { %v2034_v30 = vpop.f32.mrf.mxu2 }
  0xe3   : > { %v964_v31 = vpop.f32.mrf.mxu3 }
  0xe4   : > { %v869_v32 = vpop.f32.mrf.mxu1 }
  0xe5   : > { %v870_v50 = vadd.f32 %v869_v32, %v468_v15 }
  0xe7   : > { %v1016_v33 = vpop.f32.mrf.mxu0 }
  0xea   : > { %v913_v35 = vpop.f32.mrf.mxu2 }
  0xeb   : > { %v914_v36 = vadd.f32 %v913_v35, %v865_v34  ;;  %v967_v37 = vpop.f32.mrf.mxu3 }
  0xec   : > { %v871_v38 = vpop.f32.mrf.mxu1 }
  0xed   : > { %v963_v39 = vadd.f32 %v962_v27, %v914_v36  ;;  %v872_v58 = vadd.f32 %v871_v38, %v470_v18 }
  0xef   : > { %v1012_v40 = vadd.f32 %v1011_v25, %v963_v39  ;;  %v1018_v41 = vpop.f32.mrf.mxu0 }
  0xf1   : > { %1051 = vst [vmem:[%s2037_s13] sm:$0xff] %v1012_v40 }
  0xf2   : > { %v915_v43 = vpop.f32.mrf.mxu2 }
  0xf3   : > { %v916_v44 = vadd.f32 %v915_v43, %v867_v42  ;;  %v969_v45 = vpop.f32.mrf.mxu3 }
  0xf4   : > { %v874_v46 = vpop.f32.mrf.mxu1 }
  0xf5   : > { %v965_v47 = vadd.f32 %v964_v31, %v916_v44  ;;  %v875_v4 = vadd.f32 %v874_v46, %v2002_v57 }
  0xf7   : > { %v1014_v48 = vadd.f32 %v1013_v29, %v965_v47  ;;  %v1021_v49 = vpop.f32.mrf.mxu0 }
  0xf9   : > { %1052 = vst [vmem:[%s2037_s13 + $0x8] sm:$0xff] %v1014_v48 }
  0xfa   : > { %v918_v51 = vpop.f32.mrf.mxu2 }
  0xfb   : > { %v919_v52 = vadd.f32 %v918_v51, %v870_v50  ;;  %v972_v53 = vpop.f32.mrf.mxu3 }
  0xfc   : > { %v876_v54 = vpop.f32.mrf.mxu1 }
  0xfd   : > { %v968_v55 = vadd.f32 %v967_v37, %v919_v52  ;;  %v877_v15 = vadd.f32 %v876_v54, %v2006_v62 }
  0xff   : > { %v1017_v56 = vadd.f32 %v1016_v33, %v968_v55  ;;  %v1023_v60 = vpop.f32.mrf.mxu0 }
 0x101   : > { %1053 = vst [vmem:[%s2037_s13 + $0x10] sm:$0xff] %v1017_v56 }
 0x102   : > { %v920_v59 = vpop.f32.mrf.mxu2 }
 0x103   : > { %v921_v63 = vadd.f32 %v920_v59, %v872_v58  ;;  %v974_v0 = vpop.f32.mrf.mxu3 }
 0x104   : > { %v879_v1 = vpop.f32.mrf.mxu1 }
 0x105   : > { %v970_v2 = vadd.f32 %v969_v45, %v921_v63  ;;  %v880_v27 = vadd.f32 %v879_v1, %v2018_v11 }
 0x107   : > { %v1019_v3 = vadd.f32 %v1018_v41, %v970_v2  ;;  %v1026_v9 = vpop.f32.mrf.mxu0 }
 0x109   : > { %1054 = vst [vmem:[%s2037_s13 + $0x18] sm:$0xff] %v1019_v3 }
 0x10a   : > { %v923_v5 = vpop.f32.mrf.mxu2 }
 0x10b   : > { %v924_v7 = vadd.f32 %v923_v5, %v875_v4  ;;  %v977_v8 = vpop.f32.mrf.mxu3 }
 0x10c   : > { %v881_v12 = vpop.f32.mrf.mxu1 }
 0x10d   : > { %v973_v10 = vadd.f32 %v972_v53, %v924_v7  ;;  %v882_v62 = vadd.f32 %v881_v12, %v2024_v17 }
 0x10f   : > { %v1022_v13 = vadd.f32 %v1021_v49, %v973_v10  ;;  %v1028_v24 = vpop.f32.mrf.mxu0 }
 0x111   : > { %1055 = vst [vmem:[%s2037_s13 + $0x20] sm:$0xff] %v1022_v13 }
 0x112   : > { %v925_v18 = vpop.f32.mrf.mxu2 }
 0x113   : > { %v926_v19 = vadd.f32 %v925_v18, %v877_v15  ;;  %v979_v20 = vpop.f32.mrf.mxu3 }
 0x114   : > { %v884_v57 = vpop.f32.mrf.mxu1 }
 0x115   : > { %v975_v23 = vadd.f32 %v974_v0, %v926_v19  ;;  %v885_v11 = vadd.f32 %v884_v57, %v2004_v61 }
 0x117   : > { %v1024_v25 = vadd.f32 %v1023_v60, %v975_v23  ;;  %v1031_v34 = vpop.f32.mrf.mxu0 }
 0x119   : > { %1056 = vst [vmem:[%s2037_s13 + $0x28] sm:$0xff] %v1024_v25 }
 0x11a   : > { %v928_v28 = vpop.f32.mrf.mxu2 }
 0x11b   : > { %v929_v29 = vadd.f32 %v928_v28, %v880_v27  ;;  %v982_v32 = vpop.f32.mrf.mxu3 }
 0x11c   : > { %v886_v35 = vpop.f32.mrf.mxu1 }
 0x11d   : > { %v978_v31 = vadd.f32 %v977_v8, %v929_v29  ;;  %v887_v17 = vadd.f32 %v886_v35, %v2014_v6 }
 0x11f   : > { %v1027_v33 = vadd.f32 %v1026_v9, %v978_v31  ;;  %v1033_v42 = vpop.f32.mrf.mxu0 }
 0x121   : > { %1057 = vst [vmem:[%s2037_s13 + $0x30] sm:$0xff] %v1027_v33 }
 0x122   : > { %v930_v36 = vpop.f32.mrf.mxu2 }
 0x123   : > { %v931_v37 = vadd.f32 %v930_v36, %v882_v62  ;;  %v984_v40 = vpop.f32.mrf.mxu3 }
 0x124   : > { %v889_v44 = vpop.f32.mrf.mxu1 }
 0x125   : > { %v980_v38 = vadd.f32 %v979_v20, %v931_v37  ;;  %v890_v61 = vadd.f32 %v889_v44, %v2022_v16 }
 0x127   : > { %v1029_v39 = vadd.f32 %v1028_v24, %v980_v38  ;;  %v1036_v50 = vpop.f32.mrf.mxu0 }
 0x129   : > { %1058 = vst [vmem:[%s2037_s13 + $0x38] sm:$0xff] %v1029_v39 }
 0x12a   : > { %v933_v41 = vpop.f32.mrf.mxu2 }
 0x12b   : > { %v934_v43 = vadd.f32 %v933_v41, %v885_v11  ;;  %v987_v48 = vpop.f32.mrf.mxu3 }
 0x12c   : > { %v891_v52 = vpop.f32.mrf.mxu1 }
 0x12d   : > { %v983_v45 = vadd.f32 %v982_v32, %v934_v43  ;;  %v892_v63 = vadd.f32 %v891_v52, %v2030_v22 }
 0x12f   : > { %v1032_v46 = vadd.f32 %v1031_v34, %v983_v45  ;;  %v1038_v59 = vpop.f32.mrf.mxu0 }
 0x131   : > { %1059 = vst [vmem:[%s2037_s13 + $0x40] sm:$0xff] %v1032_v46 }
 0x132   : > { %v935_v47 = vpop.f32.mrf.mxu2 }
 0x133   : > { %v936_v49 = vadd.f32 %v935_v47, %v887_v17  ;;  %v989_v56 = vpop.f32.mrf.mxu3 }
 0x134   : > { %v894_v6 = vpop.f32.mrf.mxu1 }
 0x135   : > { %v985_v51 = vadd.f32 %v984_v40, %v936_v49  ;;  %v895_v16 = vadd.f32 %v894_v6, %v2032_v26 }
 0x137   : > { %v1034_v53 = vadd.f32 %v1033_v42, %v985_v51  ;;  %v1041_v5 = vpop.f32.mrf.mxu0 }
 0x139   : > { %1060 = vst [vmem:[%s2037_s13 + $0x48] sm:$0xff] %v1034_v53 }
 0x13a   : > { %v938_v54 = vpop.f32.mrf.mxu2 }
 0x13b   : > { %v939_v55 = vadd.f32 %v938_v54, %v890_v61  ;;  %v992_v3 = vpop.f32.mrf.mxu3 }
 0x13c   : > { %v896_v7 = vpop.f32.mrf.mxu1 }
 0x13d   : > { %v988_v58 = vadd.f32 %v987_v48, %v939_v55  ;;  %v897_v22 = vadd.f32 %v896_v7, %v2034_v30 }
 0x13f   : > { %v1037_v60 = vadd.f32 %v1036_v50, %v988_v58  ;;  %v1043_v15 = vpop.f32.mrf.mxu0 }
 0x141   : > { %1061 = vst [vmem:[%s2037_s13 + $0x50] sm:$0xff] %v1037_v60 }
 0x142   : > { %v940_v0 = vpop.f32.mrf.mxu2 }
 0x143   : > { %v941_v1 = vadd.f32 %v940_v0, %v892_v63  ;;  %v994_v13 = vpop.f32.mrf.mxu3 }
 0x144   : > { %v899_v20 = vpop.f32.mrf.mxu1 }
 0x145   : > { %v990_v2 = vadd.f32 %v989_v56, %v941_v1  ;;  %v900_v26 = vadd.f32 %v899_v20, %v2020_v14 }
 0x147   : > { %v1039_v4 = vadd.f32 %v1038_v59, %v990_v2  ;;  %v1046_v28 = vpop.f32.mrf.mxu0 }
 0x149   : > { %1062 = vst [vmem:[%s2037_s13 + $0x58] sm:$0xff] %v1039_v4 }
 0x14a   : > { %v943_v8 = vpop.f32.mrf.mxu2 }
 0x14b   : > { %v944_v9 = vadd.f32 %v943_v8, %v895_v16  ;;  %v997_v25 = vpop.f32.mrf.mxu3 }
 0x14c   : > { %v901_v30 = vpop.f32.mrf.mxu1 }
 0x14d   : > { %v993_v10 = vadd.f32 %v992_v3, %v944_v9  ;;  %v902_v32 = vadd.f32 %v901_v30, %v2028_v21 }
 0x14f   : > { %v1042_v12 = vadd.f32 %v1041_v5, %v993_v10  ;;  %v1048_v35 = vpop.f32.mrf.mxu0 }
 0x151   : > { %1063 = vst [vmem:[%s2037_s13 + $0x60] sm:$0xff] %v1042_v12 }
 0x152   : > { %v945_v18 = vpop.f32.mrf.mxu2 }
 0x153   : > { %v946_v19 = vadd.f32 %v945_v18, %v897_v22  ;;  %v999_v34 = vpop.f32.mrf.mxu3 }
 0x155   : > { %v995_v23 = vadd.f32 %v994_v13, %v946_v19 }
 0x157   : > { %v1044_v24 = vadd.f32 %v1043_v15, %v995_v23 }
 0x159   : > { %1064 = vst [vmem:[%s2037_s13 + $0x68] sm:$0xff] %v1044_v24 }
 0x15a   : > { %v948_v57 = vpop.f32.mrf.mxu2 }
 0x15b   : > { %v949_v27 = vadd.f32 %v948_v57, %v900_v26 }
 0x15d   : > { %v998_v29 = vadd.f32 %v997_v25, %v949_v27 }
 0x15f   : > { %v1047_v31 = vadd.f32 %v1046_v28, %v998_v29 }
 0x161   : > { %1065 = vst [vmem:[%s2037_s13 + $0x70] sm:$0xff] %v1047_v31 }
 0x162   : > { %v950_v33 = vpop.f32.mrf.mxu2 }
 0x163   : > { %v951_v14 = vadd.f32 %v950_v33, %v902_v32 }
 0x165   : > { %v1000_v62 = vadd.f32 %v999_v34, %v951_v14 }
 0x167   : > { %v1049_v36 = vadd.f32 %v1048_v35, %v1000_v62 }
 0x169   : > { %1066 = vst [vmem:[%s2037_s13 + $0x78] sm:$0xff] %v1049_v36 }
 0x16a   : > { %1734 = shalt.err (!%p1731_p12)
}
 0x16b   : > { %s1784_s20 = smov 128   ;;  %s1785_s11 = smov 8  }
 0x16c   : > { %1590 = dma.vmem_to_hbm [thread:$0]  (%p1878_p7), %s1081_s5, 2048, %s1083_s26, %s1068_s19, %s1784_s20, %s1784_s20, %s1785_s11  }
 0x16d PF: > { %s1097_s12 = sand.u32 1, %s1765_s15   ;;  %p2111_p13 = scmp.ge.s32.totalorder %s1777_s18, 2 }
 0x16e   : > { %s1098_s13 = scalar_lea.sflag [#allocation4], %s1097_s12 }
 0x16f   : > { %p1601_p0 = pnand %p2111_p13, %p1846_p6 }
 0x171   : > { %p1602_p3 = pneg %p1601_p0 }
 0x173   : > { %1760 = dma.done.wait (%p1602_p3), %s1098_s13, 2048  }
 0x174   : > { %1762 = vsyncadd (%p1602_p3), %s1098_s13, 4294965248  ;;  %p18_p5 = scmp.ge.s32.totalorder %s1864_s29, 4   ;;  %s2112_s15 = smov %s1769_s16 }
 0x175   : > { %s2113_s16 = smov %s1773_s17  ;;  %s2114_s17 = smov %s1874_s8 }
 0x176   : > { %s2115_s18 = smov %s1864_s29  ;;  %20 = sbr.rel (!%p18_p5) target bundleno = 6 (0x6), region = 88 }
 0x17b   :  { %1104 = vsyncpa [#allocation3], 1 }
 0x17c   :  { %1106 = vsyncpa [#allocation3 + $0x1], 1 }
 0x17d   :  { %1107 = vsyncpa [#allocation6], 1 }
 0x17e   :  { %1108 = vsyncpa [#allocation4], 1 }
 0x17f   :  { %1110 = vsyncpa [#allocation4 + $0x1], 1 }

</bundles_post_ra>
